<compile_context>
chip_gen: v7x
topology: tpu7x:2x2x1
jax: 0.10.0
libtpu: 0.0.40
codegen_flags: <defaults>
</compile_context>

<pallas_src>
import functools

import jax
import jax.numpy as jnp
import numpy as np
from jax.experimental import pallas as pl
from jax.experimental.pallas import tpu as pltpu


def _dct_matrix_np(n):
    """Orthonormal DCT-II matrix D (n, n) in float64: y = D @ x."""
    k = np.arange(n, dtype=np.int64).reshape(-1, 1)   # output (frequency) index
    j = np.arange(n, dtype=np.int64).reshape(1, -1)   # input (sample) index
    # Reduce the angle argument mod 4N in exact integer arithmetic before the
    # float multiply so large H/W do not lose precision (cos has period 4N).
    m = ((2 * j + 1) * k) % (4 * n)
    mat = np.cos(np.pi * m.astype(np.float64) / (2.0 * n)) * np.sqrt(2.0 / n)
    mat[0, :] *= np.sqrt(0.5)                          # ortho scaling of DC row
    return mat


@functools.lru_cache(maxsize=None)
def _dct_operands(h, w):
    """Cached per-shape constants: D_H (H, H) and D_W^T (W, W), as f32."""
    dh = _dct_matrix_np(h)
    dwt = _dct_matrix_np(w).T
    return (jnp.asarray(dh, dtype=jnp.float32),
            jnp.asarray(dwt, dtype=jnp.float32))


def _slabs_per_block(nc, h, w):
    """How many (H, W) slabs to process per grid step.

    Bounded by a ~512 KiB f32 input-block VMEM budget and an unroll cap of 8;
    prefer >= 2 grid steps (megacore-splittable), then the largest block.
    """
    budget_elems = (512 * 1024) // 4
    cands = [b for b in range(1, nc + 1)
             if nc % b == 0 and b <= 8 and b * h * w <= budget_elems]
    return max(cands, key=lambda b: (nc // b >= 2, b))


def _dct2d_kernel(x_ref, dh_ref, dwt_ref, o_ref, *, b):
    # x_ref  : (B, H, W)  B image slabs (batch-of-slabs block)
    # dh_ref : (H, H)     left DCT basis D_H
    # dwt_ref: (W, W)     right DCT basis D_W^T
    # o_ref  : (B, H, W)
    dh = dh_ref[...]
    dwt = dwt_ref[...]
    for s in range(b):                                  # short static unroll
        t = jnp.dot(x_ref[s], dwt, preferred_element_type=jnp.float32)
        y = jnp.dot(dh, t, preferred_element_type=jnp.float32)
        o_ref[s] = y.astype(o_ref.dtype)


def main_net1_forward(image):
    """image: (N, C, H, W) -> (N, C, H, W) orthonormal 2-D DCT along dims 2, 3."""
    n, c, h, w = image.shape
    nc = n * c
    b = _slabs_per_block(nc, h, w)
    dh, dwt = _dct_operands(h, w)

    # Free reshape only (contiguous); no wrapper transposes / extra HBM passes.
    x = image.astype(jnp.float32).reshape(nc, h, w)

    cost = pl.CostEstimate(
        flops=2 * nc * (h * w * w + h * h * w),
        transcendentals=0,
        bytes_accessed=4 * (2 * nc * h * w + h * h + w * w),
    )

    out = pl.pallas_call(
        functools.partial(_dct2d_kernel, b=b),
        out_shape=jax.ShapeDtypeStruct((nc, h, w), jnp.float32),
        grid_spec=pltpu.PrefetchScalarGridSpec(
            num_scalar_prefetch=0,
            grid=(nc // b,),
            in_specs=[
                pl.BlockSpec((b, h, w), lambda i: (i, 0, 0)),   # slab block
                pl.BlockSpec((h, h), lambda i: (0, 0)),         # D_H (constant)
                pl.BlockSpec((w, w), lambda i: (0, 0)),         # D_W^T (constant)
            ],
            out_specs=pl.BlockSpec((b, h, w), lambda i: (i, 0, 0)),
        ),
        compiler_params=pltpu.CompilerParams(
            dimension_semantics=("parallel",)),
        cost_estimate=cost,
    )(x, dh, dwt)

    return out.reshape(n, c, h, w)


if __name__ == "__main__":
    key = jax.random.PRNGKey(0)
    N, C, H, W = 2, 4, 16, 16
    image = jax.random.normal(key, (N, C, H, W), dtype=jnp.float32)

    y = jax.block_until_ready(main_net1_forward(image))

    # Reference: float64 numpy orthonormal DCT-II along dims 2 and 3
    # (same semantics as torch_dct.dct_2d(image, norm='ortho')).
    x64 = np.asarray(image, dtype=np.float64)
    dh64 = _dct_matrix_np(H)
    dw64 = _dct_matrix_np(W)
    ref = np.einsum('hk,nckw,lw->nchl', dh64, x64, dw64)
    err = float(np.max(np.abs(np.asarray(y) - ref)))
    assert np.allclose(np.asarray(y), ref, rtol=1e-4, atol=1e-4), err

    print("KERNEL_OK")
</pallas_src>

<mosaic_0001>
module attributes {stable_mosaic.version = 11 : i64} {
  func.func @_dct2d_kernel(%arg0: i32, %arg1: memref<4x16x16xf32, #tpu.memory_space<vmem>>, %arg2: memref<16x16xf32, #tpu.memory_space<vmem>>, %arg3: memref<16x16xf32, #tpu.memory_space<vmem>>, %arg4: memref<4x16x16xf32, #tpu.memory_space<vmem>>) attributes {dimension_semantics = [#tpu.dimension_semantics<parallel>], iteration_bounds = array<i64: 2>, scalar_prefetch = 0 : i64, scratch_operands = 0 : i64, tpu.core_type = #tpu.core_type<tc>, window_params = [{transform_indices = @transform_0, window_bounds = array<i64: 4, 16, 16>}, {pipeline_mode = #tpu.pipeline_mode<synchronous>, transform_indices = @transform_1, window_bounds = array<i64: 16, 16>}, {pipeline_mode = #tpu.pipeline_mode<synchronous>, transform_indices = @transform_2, window_bounds = array<i64: 16, 16>}, {transform_indices = @transform_3, window_bounds = array<i64: 4, 16, 16>}]} {
    %c0 = arith.constant 0 : index
    %c0_0 = arith.constant 0 : index
    %0 = vector.load %arg2[%c0, %c0_0] : memref<16x16xf32, #tpu.memory_space<vmem>>, vector<16x16xf32>
    %c0_1 = arith.constant 0 : index
    %c0_2 = arith.constant 0 : index
    %1 = vector.load %arg3[%c0_1, %c0_2] : memref<16x16xf32, #tpu.memory_space<vmem>>, vector<16x16xf32>
    %c0_3 = arith.constant 0 : index
    %c0_4 = arith.constant 0 : index
    %c0_5 = arith.constant 0 : index
    %2 = vector.load %arg1[%c0_3, %c0_4, %c0_5] : memref<4x16x16xf32, #tpu.memory_space<vmem>>, vector<1x16x16xf32>
    %3 = vector.shape_cast %2 : vector<1x16x16xf32> to vector<16x16xf32>
    %cst = arith.constant dense<0.000000e+00> : vector<16x16xf32>
    %4 = tpu.matmul %3, %1, %cst {dimension_numbers = #tpu.dot_dimension_numbers<[1], [0], [0], [1], [0, 0, 1, 1], [], []>} : vector<16x16xf32>, vector<16x16xf32>, vector<16x16xf32> -> vector<16x16xf32>
    %cst_6 = arith.constant dense<0.000000e+00> : vector<16x16xf32>
    %5 = tpu.matmul %0, %4, %cst_6 {dimension_numbers = #tpu.dot_dimension_numbers<[1], [0], [0], [1], [0, 0, 1, 1], [], []>} : vector<16x16xf32>, vector<16x16xf32>, vector<16x16xf32> -> vector<16x16xf32>
    %c0_7 = arith.constant 0 : index
    %c0_8 = arith.constant 0 : index
    %c0_9 = arith.constant 0 : index
    %6 = vector.load %arg4[%c0_7, %c0_8, %c0_9] : memref<4x16x16xf32, #tpu.memory_space<vmem>>, vector<1x16x16xf32>
    %7 = vector.shape_cast %6 : vector<1x16x16xf32> to vector<16x16xf32>
    %8 = vector.shape_cast %5 : vector<16x16xf32> to vector<1x16x16xf32>
    tpu.vector_store %arg4[%c0_7, %c0_8, %c0_9], %8 {strides = array<i32>} : memref<4x16x16xf32, #tpu.memory_space<vmem>>, vector<1x16x16xf32>,
    %c1 = arith.constant 1 : index
    %c0_10 = arith.constant 0 : index
    %c0_11 = arith.constant 0 : index
    %9 = vector.load %arg1[%c1, %c0_10, %c0_11] : memref<4x16x16xf32, #tpu.memory_space<vmem>>, vector<1x16x16xf32>
    %10 = vector.shape_cast %9 : vector<1x16x16xf32> to vector<16x16xf32>
    %cst_12 = arith.constant dense<0.000000e+00> : vector<16x16xf32>
    %11 = tpu.matmul %10, %1, %cst_12 {dimension_numbers = #tpu.dot_dimension_numbers<[1], [0], [0], [1], [0, 0, 1, 1], [], []>} : vector<16x16xf32>, vector<16x16xf32>, vector<16x16xf32> -> vector<16x16xf32>
    %cst_13 = arith.constant dense<0.000000e+00> : vector<16x16xf32>
    %12 = tpu.matmul %0, %11, %cst_13 {dimension_numbers = #tpu.dot_dimension_numbers<[1], [0], [0], [1], [0, 0, 1, 1], [], []>} : vector<16x16xf32>, vector<16x16xf32>, vector<16x16xf32> -> vector<16x16xf32>
    %c1_14 = arith.constant 1 : index
    %c0_15 = arith.constant 0 : index
    %c0_16 = arith.constant 0 : index
    %13 = vector.load %arg4[%c1_14, %c0_15, %c0_16] : memref<4x16x16xf32, #tpu.memory_space<vmem>>, vector<1x16x16xf32>
    %14 = vector.shape_cast %13 : vector<1x16x16xf32> to vector<16x16xf32>
    %15 = vector.shape_cast %12 : vector<16x16xf32> to vector<1x16x16xf32>
    tpu.vector_store %arg4[%c1_14, %c0_15, %c0_16], %15 {strides = array<i32>} : memref<4x16x16xf32, #tpu.memory_space<vmem>>, vector<1x16x16xf32>,
    %c2 = arith.constant 2 : index
    %c0_17 = arith.constant 0 : index
    %c0_18 = arith.constant 0 : index
    %16 = vector.load %arg1[%c2, %c0_17, %c0_18] : memref<4x16x16xf32, #tpu.memory_space<vmem>>, vector<1x16x16xf32>
    %17 = vector.shape_cast %16 : vector<1x16x16xf32> to vector<16x16xf32>
    %cst_19 = arith.constant dense<0.000000e+00> : vector<16x16xf32>
    %18 = tpu.matmul %17, %1, %cst_19 {dimension_numbers = #tpu.dot_dimension_numbers<[1], [0], [0], [1], [0, 0, 1, 1], [], []>} : vector<16x16xf32>, vector<16x16xf32>, vector<16x16xf32> -> vector<16x16xf32>
    %cst_20 = arith.constant dense<0.000000e+00> : vector<16x16xf32>
    %19 = tpu.matmul %0, %18, %cst_20 {dimension_numbers = #tpu.dot_dimension_numbers<[1], [0], [0], [1], [0, 0, 1, 1], [], []>} : vector<16x16xf32>, vector<16x16xf32>, vector<16x16xf32> -> vector<16x16xf32>
    %c2_21 = arith.constant 2 : index
    %c0_22 = arith.constant 0 : index
    %c0_23 = arith.constant 0 : index
    %20 = vector.load %arg4[%c2_21, %c0_22, %c0_23] : memref<4x16x16xf32, #tpu.memory_space<vmem>>, vector<1x16x16xf32>
    %21 = vector.shape_cast %20 : vector<1x16x16xf32> to vector<16x16xf32>
    %22 = vector.shape_cast %19 : vector<16x16xf32> to vector<1x16x16xf32>
    tpu.vector_store %arg4[%c2_21, %c0_22, %c0_23], %22 {strides = array<i32>} : memref<4x16x16xf32, #tpu.memory_space<vmem>>, vector<1x16x16xf32>,
    %c3 = arith.constant 3 : index
    %c0_24 = arith.constant 0 : index
    %c0_25 = arith.constant 0 : index
    %23 = vector.load %arg1[%c3, %c0_24, %c0_25] : memref<4x16x16xf32, #tpu.memory_space<vmem>>, vector<1x16x16xf32>
    %24 = vector.shape_cast %23 : vector<1x16x16xf32> to vector<16x16xf32>
    %cst_26 = arith.constant dense<0.000000e+00> : vector<16x16xf32>
    %25 = tpu.matmul %24, %1, %cst_26 {dimension_numbers = #tpu.dot_dimension_numbers<[1], [0], [0], [1], [0, 0, 1, 1], [], []>} : vector<16x16xf32>, vector<16x16xf32>, vector<16x16xf32> -> vector<16x16xf32>
    %cst_27 = arith.constant dense<0.000000e+00> : vector<16x16xf32>
    %26 = tpu.matmul %0, %25, %cst_27 {dimension_numbers = #tpu.dot_dimension_numbers<[1], [0], [0], [1], [0, 0, 1, 1], [], []>} : vector<16x16xf32>, vector<16x16xf32>, vector<16x16xf32> -> vector<16x16xf32>
    %c3_28 = arith.constant 3 : index
    %c0_29 = arith.constant 0 : index
    %c0_30 = arith.constant 0 : index
    %27 = vector.load %arg4[%c3_28, %c0_29, %c0_30] : memref<4x16x16xf32, #tpu.memory_space<vmem>>, vector<1x16x16xf32>
    %28 = vector.shape_cast %27 : vector<1x16x16xf32> to vector<16x16xf32>
    %29 = vector.shape_cast %26 : vector<16x16xf32> to vector<1x16x16xf32>
    tpu.vector_store %arg4[%c3_28, %c0_29, %c0_30], %29 {strides = array<i32>} : memref<4x16x16xf32, #tpu.memory_space<vmem>>, vector<1x16x16xf32>,
    return
  }
  func.func @transform_0(%arg0: i32) -> (i32, i32, i32) {
    %c0_i32 = arith.constant 0 : i32
    %c0_i32_0 = arith.constant 0 : i32
    %c0_i32_1 = arith.constant 0 : i32
    return %arg0, %c0_i32, %c0_i32_0 : i32, i32, i32
  }
  func.func @transform_1(%arg0: i32) -> (i32, i32) {
    %c0_i32 = arith.constant 0 : i32
    %c0_i32_0 = arith.constant 0 : i32
    %c0_i32_1 = arith.constant 0 : i32
    return %c0_i32, %c0_i32_0 : i32, i32
  }
  func.func @transform_2(%arg0: i32) -> (i32, i32) {
    %c0_i32 = arith.constant 0 : i32
    %c0_i32_0 = arith.constant 0 : i32
    %c0_i32_1 = arith.constant 0 : i32
    return %c0_i32, %c0_i32_0 : i32, i32
  }
  func.func @transform_3(%arg0: i32) -> (i32, i32, i32) {
    %c0_i32 = arith.constant 0 : i32
    %c0_i32_0 = arith.constant 0 : i32
    %c0_i32_1 = arith.constant 0 : i32
    return %arg0, %c0_i32, %c0_i32_0 : i32, i32, i32
  }
}

</mosaic_0001>

<bundles_post_ra>
// kernel: tpu_custom_call.1
= control target key start
LH: loop header
LB: loop body
LE: loop exit
PB: predicated region body
PF: predicated region fallthrough
CT: control target
= control target key end

     0   :  { %8 = vsyncpa [#allocation3], 0  ;;  %s1695_s0 = inlined_call_operand.hbm [shape: f32[8,16,16], index: 0, kind: input, shape index: {}]   ;;  %s1696_s1 = inlined_call_operand.hbm [shape: f32[16,16], index: 1, kind: input, shape index: {}]   ;;  %s1697_s2 = inlined_call_operand.hbm [shape: f32[16,16], index: 2, kind: input, shape index: {}]   ;;  %s1698_s3 = inlined_call_operand.hbm [shape: f32[8,16,16], index: 3, kind: output, shape index: {}]  }
   0x1   :  { %10 = vsyncpa [#allocation3 + $0x1], 0 }
   0x2   :  { %11 = vsyncpa [#allocation6], 0 }
   0x3   :  { %12 = vsyncpa [#allocation4], 0 }
   0x4   :  { %14 = vsyncpa [#allocation4 + $0x1], 0  ;;  %s1414_s12 = smov 0   ;;  %s1416_s13 = smov 0  }
   0x5   :  { %s1418_s14 = smov 0   ;;  %s1420_s15 = smov 0  }
   0x6 LB: > { %s1435_s16 = sadd.s32 4294967295, %s1384_s15   ;;  %s985_s17 = sadd.s32 4294967294, %s1384_s15   ;;  %s1384_s15 = sphi %s1420_s15, %s1718_s15   ;;  %s1380_s14 = sphi %s1418_s14, %s1717_s14   ;;  %s1376_s13 = sphi %s1416_s13, %s1716_s13   ;;  %s1372_s12 = sphi %s1414_s12, %s1715_s12  }
   0x7   : > { %p40_p0 = scmp.ne.s32.totalorder %s1376_s13, %s1372_s12  ;;  %p1699_p1 = scmp.eq.s32.totalorder %s1435_s16, 0 }
   0x8   : > { %p112_p3 = scmp.eq.s32.totalorder %s985_s17, 1  ;;  %p986_p5 = scmp.ge.s32.totalorder %s1384_s15, 1 }
   0x9   : > { %p1444_p4 = por %p1699_p1, %p40_p0  ;;  %p119_p7 = scmp.lt.s32.totalorder %s1384_s15, 3 }
   0xa   : > { %p1449_p6 = por %p112_p3, %p40_p0  ;;  %s1386_s21 = smov [#allocation5]  }
   0xb   : > { %s1702_s18 = scalar_select %p1444_p4, 1, 0 }
   0xc   : > { %s1703_s19 = scalar_select %p1449_p6, 1, 0 }
   0xd   : > { %p1454_p8 = pnand %p986_p5, %p119_p7  ;;  %s131_s22 = sshll.u32 %s1386_s21, 4  ;;  %s1458_s22 = int_to_ptr.vmem [resolvable:$true] %s131_s22 }
   0xe   : > { %s1387_s24 = smov [#allocation7]   ;;  %s1228_s28 = scalar_lea.hbm %s1696_s1, 256 }
   0xf   : > { %p1169_p9 = pneg %p1454_p8  ;;  %s144_s25 = sshll.u32 %s1387_s24, 4  ;;  %s1469_s25 = int_to_ptr.vmem [resolvable:$true] %s144_s25 }
  0x10   : > { %p1229_p12 = scmp.ne.s32.totalorder %s1696_s1, %s1228_s28  ;;  %p1235_p5 = scmp.lt.u32.totalorder %s1228_s28, %s1696_s1 }
  0x11   : > { %p1465_p11 = pnand %p1169_p9, %p1699_p1 }
  0x13   : > { %p1230_p13 = pneg %p1465_p11 }
  0x15   : > { %p1231_p0 = pnand %p1230_p13, %p1229_p12 }
  0x17   : > { %p1232_p3 = pneg %p1231_p0 }
  0x19   : > { %p1237_p7 = pnand %p1235_p5, %p1232_p3 }
  0x1b   : > { %1240 = shalt.err (!%p1237_p7)
}
  0x1c   : > { %s1241_s6 = scalar_lea.vmem %s1458_s22, 256  ;;  %p1249_p2 = scmp.lt.s32.totalorder %s1458_s22, %s1458_s22 }
  0x1d   : > { %p1242_p9 = scmp.ne.s32.totalorder %s1458_s22, %s1241_s6  ;;  %p1250_p12 = scmp.lt.s32.totalorder %s1241_s6, %s1241_s6 }
  0x1f   : > { %p1244_p10 = pnand %p1242_p9, %p1230_p13  ;;  %p1251_p0 = por %p1250_p12, %p1249_p2 }
  0x21   : > { %p1245_p1 = pneg %p1244_p10 }
  0x23   : > { %p1252_p6 = pnand %p1251_p0, %p1245_p1 }
  0x25   : > { %1255 = shalt.err (!%p1252_p6)
}
  0x26   : > { %s1388_s7 = smov 128   ;;  %s1389_s8 = smov 8  }
  0x27   : > { %1172 = dma.hbm_to_vmem [thread:$0]  (!%p1465_p11), %s1696_s1, 256, %s1458_s22, [#allocation6], %s1388_s7, %s1388_s7, %s1389_s8  }
  0x28   : > { %s1256_s21 = scalar_lea.hbm %s1697_s2, 256 }
  0x29   : > { %p1257_p1 = scmp.ne.s32.totalorder %s1697_s2, %s1256_s21  ;;  %p1263_p10 = scmp.lt.u32.totalorder %s1256_s21, %s1697_s2 }
  0x2b   : > { %p1259_p2 = pnand %p1257_p1, %p1230_p13 }
  0x2d   : > { %p1260_p6 = pneg %p1259_p2 }
  0x2f   : > { %p1265_p3 = pnand %p1263_p10, %p1260_p6 }
  0x31   : > { %1268 = shalt.err (!%p1265_p3)
}
  0x32   : > { %s1269_s22 = scalar_lea.vmem %s1469_s25, 256  ;;  %p1277_p12 = scmp.lt.s32.totalorder %s1469_s25, %s1469_s25 }
  0x33   : > { %p1270_p5 = scmp.ne.s32.totalorder %s1469_s25, %s1269_s22  ;;  %p1278_p0 = scmp.lt.s32.totalorder %s1269_s22, %s1269_s22 }
  0x35   : > { %p1272_p7 = pnand %p1270_p5, %p1230_p13  ;;  %p1279_p1 = por %p1278_p0, %p1277_p12 }
  0x37   : > { %p1273_p9 = pneg %p1272_p7 }
  0x39   : > { %p1280_p2 = pnand %p1279_p1, %p1273_p9 }
  0x3b   : > { %1283 = shalt.err (!%p1280_p2)
}
  0x3c   : > { %1175 = dma.hbm_to_vmem [thread:$0]  (!%p1465_p11), %s1697_s2, 256, %s1469_s25, [#allocation6], %s1388_s7, %s1388_s7, %s1389_s8  }
  0x3d   : > { %s1530_s23 = sadd.s32 1, %s1384_s15   ;;  %s27_s4 = sadd.s32 1, %s1380_s14 }
  0x3e   : > { %s24_s5 = ssub.s32 %s1384_s15, %s1530_s23  ;;  %p34_p13 = scmp.ne.s32.totalorder %s1380_s14, %s1376_s13 }
  0x3f   : > { %p25_p6 = scmp.eq.s32.totalorder %s24_s5, 0  ;;  %p35_p10 = scmp.eq.s32.totalorder %s1384_s15, 0 }
  0x40   : > { %p1706_p3 = scmp.eq.s32.totalorder %s1435_s16, 1  ;;  %p1186_p7 = scmp.lt.s32.totalorder %s1384_s15, 2 }
  0x41   : > { %s1546_s9 = scalar_select %p25_p6, %s1380_s14, %s27_s4  }
  0x42   : > { %p1540_p5 = por %p1706_p3, %p34_p13  ;;  %p36_p9 = por %p35_p10, %p34_p13 }
  0x43   : > { %s158_s10 = sand.u32 1, %s1380_s14   ;;  %s1034_s25 = sshll.u32 %s1384_s15, 10 }
  0x44   : > { %s1707_s6 = scalar_select %p1540_p5, 1, 0 }
  0x45   : > { %s990_s11 = sshll.u32 %s158_s10, 6  ;;  %s1553_s24 = scalar_lea.hbm %s1695_s0, %s1034_s25 }
  0x46   : > { %s162_s26 = scalar_lea.vmem [#allocation2], %s990_s11  ;;  %p1557_p11 = pnand %p1186_p7, %p36_p9 }
  0x47   : > { %s170_s27 = sshll.u32 %s162_s26, 4  ;;  %s1561_s22 = scalar_lea.sflag [#allocation3], %s158_s10  ;;  %s1555_s27 = int_to_ptr.vmem [resolvable:$true] %s170_s27 }
  0x48   : > { %s1284_s29 = scalar_lea.hbm %s1553_s24, 1024  ;;  %p1286_p0 = pneg %p1557_p11 }
  0x49   : > { %p1285_p12 = scmp.ne.s32.totalorder %s1553_s24, %s1284_s29  ;;  %s1289_s5 = scalar_lea.hbm %s1695_s0, 2048 }
  0x4a   : > { %p1290_p13 = scmp.lt.u32.totalorder %s1553_s24, %s1695_s0  ;;  %p1291_p6 = scmp.lt.u32.totalorder %s1289_s5, %s1284_s29 }
  0x4b   : > { %p1287_p1 = pnand %p1286_p0, %p1285_p12  ;;  %p1293_p3 = scmp.lt.u32.totalorder %s1284_s29, %s1553_s24 }
  0x4c   : > { %p1292_p10 = por %p1291_p6, %p1290_p13 }
  0x4d   : > { %p1288_p2 = pneg %p1287_p1 }
  0x4e   : > { %p1294_p7 = por %p1293_p3, %p1292_p10 }
  0x50   : > { %p1295_p9 = pnand %p1294_p7, %p1288_p2 }
  0x52   : > { %1298 = shalt.err (!%p1295_p9)
}
  0x53   : > { %s1299_s10 = scalar_lea.vmem %s1555_s27, 1024  ;;  %s1390_s17 = smov [#allocation2]  }
  0x54   : > { %p1300_p12 = scmp.ne.s32.totalorder %s1555_s27, %s1299_s10  ;;  %s1304_s21 = sshll.u32 %s1390_s17, 4  ;;  %s1305_s21 = int_to_ptr.vmem [resolvable:$false] %s1304_s21 }
  0x55   : > { %s1306_s26 = scalar_lea.vmem %s1305_s21, 2048  ;;  %p1307_p4 = scmp.lt.s32.totalorder %s1555_s27, %s1305_s21 }
  0x56   : > { %p1302_p1 = pnand %p1300_p12, %p1286_p0  ;;  %p1308_p13 = scmp.lt.s32.totalorder %s1306_s26, %s1299_s10 }
  0x58   : > { %p1303_p5 = pneg %p1302_p1  ;;  %p1309_p6 = por %p1308_p13, %p1307_p4 }
  0x5a   : > { %p1310_p10 = pnand %p1309_p6, %p1303_p5 }
  0x5c   : > { %1313 = shalt.err (!%p1310_p10)
}
  0x5d   : > { %1179 = dma.hbm_to_vmem [thread:$0]  (!%p1557_p11), %s1553_s24, 1024, %s1555_s27, %s1561_s22, %s1388_s7, %s1388_s7, %s1389_s8  }
  0x5e   : > { %182 = sbr.rel (%p1454_p8) target bundleno = 571 (0x23b), region = 32  ;;  %s1595_s29 = sand.u32 (!%p1454_p8), 1, %s1376_s13  }
  0x5f   : > { %s995_s30 = sshll.u32 (!%p1454_p8), %s1595_s29, 6  ;;  %s185_s4 = scalar_lea.sflag (!%p1454_p8), [#allocation3], %s1595_s29 }
  0x60   : > { %s1601_s28 = scalar_lea.vmem (!%p1454_p8), [#allocation2], %s995_s30  ;;  %p1709_p4 = scmp.ne.s32.totalorder (!%p1454_p8), %s1702_s18, 0 }
  0x65   : > { %1359 = dma.done.wait (%p1709_p4), %s185_s4, 1024  }
  0x66   : > { %1361 = vsyncadd (%p1709_p4), %s185_s4, 4294966272  ;;  %p1710_p5 = scmp.eq.s32.totalorder %s1435_s16, 0 }
  0x68   : > { %1363 = dma.done.wait (%p1710_p5), [#allocation6], 512   ;;  %p1711_p8 = pmov %p1710_p5 }
  0x69   : > { %vm227_vm0 = vcmask 130048   ;;  %v223_v0 = vld [vmem:[#allocation7] sm:$0xff]  ;;  %v224_v1 = vld [vmem:[#allocation7 + $0x8] sm:$0xff]  ;;  %v225_v2 = vld [vmem:[%s1601_s28] sm:$0xff]  ;;  %s218_s18 = scalar_lea.vmem [#allocation8], %s995_s30  ;;  %s1036_s7 = sshll.u32 %s1435_s16, 10 }
  0x6a   : > { %1365 = vsyncadd (%p1711_p8), [#allocation6], 4294966784  ;;  %v1125_v3 = vpack.c.bf16 %v224_v1, %v223_v0  ;;  %1073 = vmatprep.mubr.msk.f32.mxu0 %vm227_vm0, %v225_v2  ;;  %v226_v4 = vld [vmem:[%s1601_s28 + $0x8] sm:$0xff]  ;;  %v1003_v5 = vld [vmem:[%s1601_s28 + $0x10] sm:$0xff]  ;;  %s893_s20 = sshll.u32 %s218_s18, 4  ;;  %s1649_s27 = scalar_lea.hbm %s1698_s3, %s1036_s7  ;;  %s1643_s20 = int_to_ptr.vmem [resolvable:$true] %s893_s20 }
  0x6b   : > { %v1004_v6 = vld [vmem:[%s1601_s28 + $0x18] sm:$0xff]  ;;  %v1011_v7 = vld [vmem:[%s1601_s28 + $0x20] sm:$0xff]  ;;  %v1012_v8 = vld [vmem:[%s1601_s28 + $0x28] sm:$0xff]  ;;  %s879_s16 = scalar_lea.sflag [#allocation4], %s1595_s29  ;;  %s1314_s22 = scalar_lea.vmem %s1643_s20, 1024 }
  0x6c   : > { %1126 = vmatprep.subr.bf16.mxu0 %v1125_v3  ;;  %v1019_v9 = vld [vmem:[%s1601_s28 + $0x30] sm:$0xff]  ;;  %v1020_v10 = vld [vmem:[%s1601_s28 + $0x38] sm:$0xff]  ;;  %v221_v11 = vld [vmem:[#allocation5] sm:$0xff]  ;;  %p1315_p11 = scmp.ne.s32.totalorder %s1643_s20, %s1314_s22  ;;  %p1712_p0 = scmp.ne.s32.totalorder %s1707_s6, 0 }
  0x6d   : > { %1128 = vmatpush3.bf16.msra.mxu0 %v1125_v3  ;;  %1080 = vmatprep.mubr.msk.f32.mxu1 %vm227_vm0, %v221_v11  ;;  %v222_v17 = vld [vmem:[#allocation5 + $0x8] sm:$0xff]  ;;  %s1391_s5 = smov [#allocation8]  }
  0x6e   : > { %1134 = vmatprep.subr.bf16.mxu0 %v1125_v3  ;;  %p1316_p2 = pnand %p1315_p11, %p1712_p0  ;;  %s1318_s11 = sshll.u32 %s1391_s5, 4  ;;  %s1319_s11 = int_to_ptr.vmem [resolvable:$false] %s1318_s11 }
  0x6f   : > { %s1320_s25 = scalar_lea.vmem %s1319_s11, 2048  ;;  %p1321_p7 = scmp.lt.s32.totalorder %s1643_s20, %s1319_s11 }
  0x70   : > { %1074 = vmatmul.mubr.msk.f32.vlgmr.msra.gmra.mrb[0].mxu0 %vm227_vm0, %v226_v4  ;;  %p1317_p3 = pneg %p1316_p2  ;;  %p1322_p9 = scmp.lt.s32.totalorder %s1320_s25, %s1314_s22 }
  0x71   : > { %1136 = vmatpush3.bf16.msra.mxu0 %v1125_v3  ;;  %1087 = vmatprep.mubr.msk.f32.mxu0 %vm227_vm0, %v1003_v5 }
  0x72   : > { %1142 = vmatprep.subr.bf16.mxu0 %v1125_v3  ;;  %p1323_p12 = por %p1322_p9, %p1321_p7 }
  0x74   : > { %1088 = vmatmul.mubr.msk.f32.vlgmr.msra.gmra.mrb[2].mxu0 %vm227_vm0, %v1004_v6  ;;  %p1324_p1 = pnand %p1323_p12, %p1317_p3 }
  0x75   : > { %1144 = vmatpush3.bf16.msra.mxu0 %v1125_v3  ;;  %1101 = vmatprep.mubr.msk.f32.mxu0 %vm227_vm0, %v1011_v7 }
  0x76   : > { %1150 = vmatprep.subr.bf16.mxu0 %v1125_v3 }
  0x78   : > { %1102 = vmatmul.mubr.msk.f32.vlgmr.msra.gmra.mrb[4].mxu0 %vm227_vm0, %v1012_v8 }
  0x79   : > { %1152 = vmatpush3.bf16.msra.mxu0 %v1125_v3  ;;  %1115 = vmatprep.mubr.msk.f32.mxu0 %vm227_vm0, %v1019_v9 }
  0x7c   : > { %1116 = vmatmul.mubr.msk.f32.vlgmr.msra.gmra.mrb[6].mxu0 %vm227_vm0, %v1020_v10 }
 0x143   : > { %v1075_v12 = vpop.f32.mrb[0].mxu0 }
 0x144   : > { %v300_v13 = vpop.f32.mrb[1].mxu0 }
 0x145   : > { %v1129_v14 = vpack.c.bf16 %v1075_v12, %v300_v13 }
 0x147   : > { %1130 = vmatprep.subr.bf16.mxu1 %v1129_v14  ;;  %v1089_v15 = vpop.f32.mrb[2].mxu0 }
 0x148   : > { %1132 = vmatpush3.bf16.msra.mxu1 %v1129_v14  ;;  %v467_v16 = vpop.f32.mrb[3].mxu0 }
 0x149   : > { %v1137_v18 = vpack.c.bf16 %v1089_v15, %v467_v16 }
 0x14b   : > { %1081 = vmatmul.mubr.msk.f32.vlgmr.msra.gmra.mrb[0].mxu1 %vm227_vm0, %v222_v17  ;;  %1138 = vmatprep.subr.bf16.mxu1 %v1137_v18  ;;  %v1103_v19 = vpop.f32.mrb[4].mxu0 }
 0x14c   : > { %1140 = vmatpush3.bf16.msra.mxu1 %v1137_v18  ;;  %v629_v20 = vpop.f32.mrb[5].mxu0  ;;  %1094 = vmatprep.mubr.msk.f32.mxu1 %vm227_vm0, %v221_v11 }
 0x14d   : > { %v1145_v21 = vpack.c.bf16 %v1103_v19, %v629_v20 }
 0x14f   : > { %1095 = vmatmul.mubr.msk.f32.vlgmr.msra.gmra.mrb[2].mxu1 %vm227_vm0, %v222_v17  ;;  %1146 = vmatprep.subr.bf16.mxu1 %v1145_v21  ;;  %v1117_v22 = vpop.f32.mrb[6].mxu0 }
 0x150   : > { %1148 = vmatpush3.bf16.msra.mxu1 %v1145_v21  ;;  %v791_v23 = vpop.f32.mrb[7].mxu0  ;;  %1108 = vmatprep.mubr.msk.f32.mxu1 %vm227_vm0, %v221_v11 }
 0x151   : > { %v1153_v24 = vpack.c.bf16 %v1117_v22, %v791_v23 }
 0x153   : > { %1109 = vmatmul.mubr.msk.f32.vlgmr.msra.gmra.mrb[4].mxu1 %vm227_vm0, %v222_v17  ;;  %1154 = vmatprep.subr.bf16.mxu1 %v1153_v24 }
 0x154   : > { %1156 = vmatpush3.bf16.msra.mxu1 %v1153_v24  ;;  %1122 = vmatprep.mubr.msk.f32.mxu1 %vm227_vm0, %v221_v11 }
 0x157   : > { %1123 = vmatmul.mubr.msk.f32.vlgmr.msra.gmra.mrb[6].mxu1 %vm227_vm0, %v222_v17 }
 0x21e   : > { %v1082_v25 = vpop.f32.mrb[0].mxu1 }
 0x21f   : > { %391 = vst.msk [vmem:[%s218_s18 + $0x8] sm:$0xff] %vm227_vm0, %v1082_v25  ;;  %v381_v26 = vpop.f32.mrb[1].mxu1 }
 0x220   : > { %390 = vst.msk [vmem:[%s218_s18] sm:$0xff] %vm227_vm0, %v381_v26 }
 0x222   : > { %v1096_v27 = vpop.f32.mrb[2].mxu1 }
 0x223   : > { %1010 = vst.msk [vmem:[%s218_s18 + $0x18] sm:$0xff] %vm227_vm0, %v1096_v27  ;;  %v542_v28 = vpop.f32.mrb[3].mxu1 }
 0x224   : > { %1009 = vst.msk [vmem:[%s218_s18 + $0x10] sm:$0xff] %vm227_vm0, %v542_v28 }
 0x226   : > { %v1110_v29 = vpop.f32.mrb[4].mxu1 }
 0x227   : > { %1018 = vst.msk [vmem:[%s218_s18 + $0x28] sm:$0xff] %vm227_vm0, %v1110_v29  ;;  %v704_v30 = vpop.f32.mrb[5].mxu1 }
 0x228   : > { %1017 = vst.msk [vmem:[%s218_s18 + $0x20] sm:$0xff] %vm227_vm0, %v704_v30 }
 0x22a   : > { %v1124_v31 = vpop.f32.mrb[6].mxu1 }
 0x22b   : > { %1026 = vst.msk [vmem:[%s218_s18 + $0x38] sm:$0xff] %vm227_vm0, %v1124_v31  ;;  %v866_v32 = vpop.f32.mrb[7].mxu1 }
 0x22c   : > { %1025 = vst.msk [vmem:[%s218_s18 + $0x30] sm:$0xff] %vm227_vm0, %v866_v32 }
 0x22d   : > { %1327 = shalt.err (!%p1324_p1)
}
 0x22e   : > { %s1328_s10 = scalar_lea.hbm %s1649_s27, 1024  ;;  %s1332_s26 = scalar_lea.hbm %s1698_s3, 2048 }
 0x22f   : > { %p1329_p13 = scmp.ne.s32.totalorder %s1649_s27, %s1328_s10  ;;  %p1333_p4 = scmp.lt.u32.totalorder %s1649_s27, %s1698_s3 }
 0x230   : > { %p1334_p5 = scmp.lt.u32.totalorder %s1332_s26, %s1328_s10  ;;  %p1336_p11 = scmp.lt.u32.totalorder %s1328_s10, %s1649_s27 }
 0x231   : > { %p1330_p6 = pnand %p1329_p13, %p1712_p0 }
 0x232   : > { %p1335_p8 = por %p1334_p5, %p1333_p4 }
 0x233   : > { %p1331_p10 = pneg %p1330_p6 }
 0x234   : > { %p1337_p2 = por %p1336_p11, %p1335_p8 }
 0x236   : > { %p1338_p3 = pnand %p1337_p2, %p1331_p10 }
 0x238   : > { %1341 = shalt.err (!%p1338_p3)
}
 0x239   : > { %s1392_s28 = smov 128   ;;  %s1393_s18 = smov 8  }
 0x23a   : > { %1167 = dma.vmem_to_hbm [thread:$0]  (%p1712_p0), %s1643_s20, 1024, %s1649_s27, %s879_s16, %s1392_s28, %s1392_s28, %s1393_s18  }
 0x23b PF: > { %s908_s7 = sand.u32 1, %s1372_s12   ;;  %p1713_p7 = scmp.ne.s32.totalorder %s1703_s19, 0 }
 0x23c   : > { %p1714_p9 = scmp.ge.s32.totalorder %s1384_s15, 2  ;;  %s909_s8 = scalar_lea.sflag [#allocation4], %s908_s7 }
 0x23e   : > { %p1181_p12 = pnand %p1714_p9, %p1713_p7 }
 0x240   : > { %1367 = dma.done.wait (!%p1181_p12), %s909_s8, 1024  }
 0x241   : > { %1369 = vsyncadd (!%p1181_p12), %s909_s8, 4294966272  ;;  %p17_p1 = scmp.ge.s32.totalorder %s1530_s23, 4   ;;  %s1715_s12 = smov %s1376_s13 }
 0x242   : > { %s1716_s13 = smov %s1380_s14  ;;  %s1717_s14 = smov %s1546_s9 }
 0x243   : > { %s1718_s15 = smov %s1530_s23  ;;  %19 = sbr.rel (!%p17_p1) target bundleno = 6 (0x6), region = 91 }
 0x24a   :  { %914 = vsyncpa [#allocation3], 1 }
 0x24b   :  { %916 = vsyncpa [#allocation3 + $0x1], 1 }
 0x24c   :  { %917 = vsyncpa [#allocation6], 1 }
 0x24d   :  { %918 = vsyncpa [#allocation4], 1 }
 0x24e   :  { %920 = vsyncpa [#allocation4 + $0x1], 1 }

</bundles_post_ra>
